<compile_context>
chip_gen: v7x
topology: tpu7x:2x2x1
jax: 0.10.0
libtpu: 0.0.40
codegen_flags: <defaults>
</compile_context>

<pallas_src>
import jax
import jax.numpy as jnp
from jax import lax
from jax.experimental import pallas as pl
from jax.experimental.pallas import tpu as pltpu


def _round_up(x, m):
    return (x + m - 1) // m * m


@jax.jit
def conv2d_pallas(x, weight, bias):
    """Valid (padding=0), stride-1 conv2d. x:(N,C,H,W), weight:(OC,C,KH,KW), bias:(OC,)."""
    N, C, H, W = x.shape
    OC, _, KH, KW = weight.shape
    OH, OW = H - KH + 1, W - KW + 1

    HW = H * W                                 # per-batch lane-dense image width
    s_max = (KH - 1) * W + (KW - 1)            # largest in-kernel lane shift
    L_in = _round_up(HW + s_max, 128)          # per-batch input slab incl. zero halo
    assert L_in >= HW + s_max                  # shifted slices stay in the slab
    assert HW % 128 == 0, "H*W must be a multiple of 128 for lane-dense output"

    C_pad = _round_up(C, 8)
    OC_pad = _round_up(OC, 8)
    KC = KW * C_pad                            # contraction chunk per kh

    # ---- layout prep (fused under jit; one pad + cast, no im2col in HBM) ----
    # NCHW is already channel-major per batch: reshape is free, then pad C + halo.
    x3d = jnp.pad(x.reshape(N, C, HW),
                  ((0, 0), (0, C_pad - C), (0, L_in - HW))).astype(jnp.bfloat16)

    # weight -> (KH, OC_pad, KW*C_pad); chunk-column order (kw, c) matches the
    # in-kernel patch construction.  Padded rows/cols are zero.
    w4d = jnp.transpose(weight, (2, 0, 3, 1))                     # (KH, OC, KW, C)
    w4d = jnp.pad(w4d, ((0, 0), (0, OC_pad - OC), (0, 0), (0, C_pad - C)))
    w3d = w4d.reshape(KH, OC_pad, KC).astype(jnp.bfloat16)

    b2d = jnp.pad(bias, (0, OC_pad - OC)).astype(jnp.float32).reshape(OC_pad, 1)

    def kernel(x_ref, w_ref, b_ref, o_ref):
        xx = x_ref[...]                                   # (C_pad, L_in) bf16
        acc = jnp.zeros((OC_pad, HW), jnp.float32)
        # In-kernel im2col, one kh chunk at a time: KH small MXU matmuls,
        # never materializing the full patch matrix.
        for kh in range(KH):
            pieces = [xx[:, kh * W + kw: kh * W + kw + HW] for kw in range(KW)]
            patch = jnp.concatenate(pieces, axis=0)       # (KW*C_pad, HW) bf16
            acc = acc + jnp.dot(w_ref[kh], patch,
                                preferred_element_type=jnp.float32)
        o_ref[...] = (acc + b_ref[...]).astype(o_ref.dtype)

    out3d = pl.pallas_call(
        kernel,
        out_shape=jax.ShapeDtypeStruct((N, OC_pad, HW), jnp.float32),
        grid=(N,),
        in_specs=[
            pl.BlockSpec((None, C_pad, L_in), lambda n: (n, 0, 0)),
            pl.BlockSpec((KH, OC_pad, KC), lambda n: (0, 0, 0)),
            pl.BlockSpec((OC_pad, 1), lambda n: (0, 0)),
        ],
        out_specs=pl.BlockSpec((None, OC_pad, HW), lambda n: (n, 0, 0)),
        compiler_params=pltpu.CompilerParams(
            dimension_semantics=("parallel",)),
    )(x3d, w3d, b2d)

    # Output is already batch/channel-major: just un-pad / un-flatten.
    # Invalid (h >= OH or w >= OW) columns and padded channels are sliced off.
    out = out3d.reshape(N, OC_pad, H, W)[:, :OC, :OH, :OW]
    return out


if __name__ == "__main__":
    key = jax.random.PRNGKey(0)
    kx, kw_key, kb_key = jax.random.split(key, 3)

    # Shapes consistent with the module: in_channels=3 required.
    N, C, H, W = 2, 3, 16, 16
    OC, KH, KW = 6, 3, 3

    x = jax.random.normal(kx, (N, C, H, W), dtype=jnp.float32)
    # Deterministic PyTorch-style uniform init (not a checkpoint).
    fan_in = C * KH * KW
    bound = 1.0 / (fan_in ** 0.5)
    weight = jax.random.uniform(kw_key, (OC, C, KH, KW), jnp.float32, -bound, bound)
    bias = jax.random.uniform(kb_key, (OC,), jnp.float32, -bound, bound)

    out = jax.block_until_ready(conv2d_pallas(x, weight, bias))

    # Reference: XLA conv with the same NCHW / OIHW semantics as PyTorch.
    ref = lax.conv_general_dilated(
        x, weight, window_strides=(1, 1), padding="VALID",
        dimension_numbers=("NCHW", "OIHW", "NCHW"),
    ) + bias.reshape(1, OC, 1, 1)
    ref = jax.block_until_ready(ref)

    assert out.shape == (N, OC, H - KH + 1, W - KW + 1), out.shape
    max_err = float(jnp.max(jnp.abs(out - ref)))
    assert jnp.allclose(out, ref, atol=3e-2, rtol=3e-2), (
        f"mismatch vs reference conv (max abs err {max_err})")
    print("KERNEL_OK")
</pallas_src>

<mosaic_0001>
module attributes {stable_mosaic.version = 11 : i64} {
  func.func @kernel(%arg0: i32, %arg1: memref<1x8x384xbf16, #tpu.memory_space<vmem>>, %arg2: memref<3x8x24xbf16, #tpu.memory_space<vmem>>, %arg3: memref<8x1xf32, #tpu.memory_space<vmem>>, %arg4: memref<1x8x256xf32, #tpu.memory_space<vmem>>) attributes {dimension_semantics = [#tpu.dimension_semantics<parallel>], iteration_bounds = array<i64: 2>, scalar_prefetch = 0 : i64, scratch_operands = 0 : i64, tpu.core_type = #tpu.core_type<tc>, window_params = [{transform_indices = @transform_0, window_bounds = array<i64: 1, 8, 384>}, {pipeline_mode = #tpu.pipeline_mode<synchronous>, transform_indices = @transform_1, window_bounds = array<i64: 3, 8, 24>}, {pipeline_mode = #tpu.pipeline_mode<synchronous>, transform_indices = @transform_2, window_bounds = array<i64: 8, 1>}, {transform_indices = @transform_3, window_bounds = array<i64: 1, 8, 256>}]} {
    %c0 = arith.constant 0 : index
    %c0_0 = arith.constant 0 : index
    %c0_1 = arith.constant 0 : index
    %0 = vector.load %arg1[%c0, %c0_0, %c0_1] : memref<1x8x384xbf16, #tpu.memory_space<vmem>>, vector<1x8x384xbf16>
    %1 = vector.shape_cast %0 : vector<1x8x384xbf16> to vector<8x384xbf16>
    %cst = arith.constant 0.000000e+00 : f32
    %2 = vector.broadcast %cst : f32 to vector<8x256xf32>
    %3 = vector.extract_strided_slice %1 {offsets = [0, 0], sizes = [8, 256], strides = [1, 1]} : vector<8x384xbf16> to vector<8x256xbf16>
    %4 = vector.extract_strided_slice %1 {offsets = [0, 1], sizes = [8, 256], strides = [1, 1]} : vector<8x384xbf16> to vector<8x256xbf16>
    %5 = vector.extract_strided_slice %1 {offsets = [0, 2], sizes = [8, 256], strides = [1, 1]} : vector<8x384xbf16> to vector<8x256xbf16>
    %6 = tpu.concatenate %3, %4, %5 in 0 : vector<8x256xbf16>, vector<8x256xbf16>, vector<8x256xbf16> -> vector<24x256xbf16>
    %c0_2 = arith.constant 0 : index
    %c0_3 = arith.constant 0 : index
    %c0_4 = arith.constant 0 : index
    %7 = vector.load %arg2[%c0_2, %c0_3, %c0_4] : memref<3x8x24xbf16, #tpu.memory_space<vmem>>, vector<1x8x24xbf16>
    %8 = vector.shape_cast %7 : vector<1x8x24xbf16> to vector<8x24xbf16>
    %cst_5 = arith.constant dense<0.000000e+00> : vector<8x256xf32>
    %9 = tpu.matmul %8, %6, %cst_5 {dimension_numbers = #tpu.dot_dimension_numbers<[1], [0], [0], [1], [0, 0, 1, 1], [], []>} : vector<8x24xbf16>, vector<24x256xbf16>, vector<8x256xf32> -> vector<8x256xf32>
    %10 = arith.addf %2, %9 : vector<8x256xf32>
    %11 = vector.extract_strided_slice %1 {offsets = [0, 16], sizes = [8, 256], strides = [1, 1]} : vector<8x384xbf16> to vector<8x256xbf16>
    %12 = vector.extract_strided_slice %1 {offsets = [0, 17], sizes = [8, 256], strides = [1, 1]} : vector<8x384xbf16> to vector<8x256xbf16>
    %13 = vector.extract_strided_slice %1 {offsets = [0, 18], sizes = [8, 256], strides = [1, 1]} : vector<8x384xbf16> to vector<8x256xbf16>
    %14 = tpu.concatenate %11, %12, %13 in 0 : vector<8x256xbf16>, vector<8x256xbf16>, vector<8x256xbf16> -> vector<24x256xbf16>
    %c1 = arith.constant 1 : index
    %c0_6 = arith.constant 0 : index
    %c0_7 = arith.constant 0 : index
    %15 = vector.load %arg2[%c1, %c0_6, %c0_7] : memref<3x8x24xbf16, #tpu.memory_space<vmem>>, vector<1x8x24xbf16>
    %16 = vector.shape_cast %15 : vector<1x8x24xbf16> to vector<8x24xbf16>
    %cst_8 = arith.constant dense<0.000000e+00> : vector<8x256xf32>
    %17 = tpu.matmul %16, %14, %cst_8 {dimension_numbers = #tpu.dot_dimension_numbers<[1], [0], [0], [1], [0, 0, 1, 1], [], []>} : vector<8x24xbf16>, vector<24x256xbf16>, vector<8x256xf32> -> vector<8x256xf32>
    %18 = arith.addf %10, %17 : vector<8x256xf32>
    %19 = vector.extract_strided_slice %1 {offsets = [0, 32], sizes = [8, 256], strides = [1, 1]} : vector<8x384xbf16> to vector<8x256xbf16>
    %20 = vector.extract_strided_slice %1 {offsets = [0, 33], sizes = [8, 256], strides = [1, 1]} : vector<8x384xbf16> to vector<8x256xbf16>
    %21 = vector.extract_strided_slice %1 {offsets = [0, 34], sizes = [8, 256], strides = [1, 1]} : vector<8x384xbf16> to vector<8x256xbf16>
    %22 = tpu.concatenate %19, %20, %21 in 0 : vector<8x256xbf16>, vector<8x256xbf16>, vector<8x256xbf16> -> vector<24x256xbf16>
    %c2 = arith.constant 2 : index
    %c0_9 = arith.constant 0 : index
    %c0_10 = arith.constant 0 : index
    %23 = vector.load %arg2[%c2, %c0_9, %c0_10] : memref<3x8x24xbf16, #tpu.memory_space<vmem>>, vector<1x8x24xbf16>
    %24 = vector.shape_cast %23 : vector<1x8x24xbf16> to vector<8x24xbf16>
    %cst_11 = arith.constant dense<0.000000e+00> : vector<8x256xf32>
    %25 = tpu.matmul %24, %22, %cst_11 {dimension_numbers = #tpu.dot_dimension_numbers<[1], [0], [0], [1], [0, 0, 1, 1], [], []>} : vector<8x24xbf16>, vector<24x256xbf16>, vector<8x256xf32> -> vector<8x256xf32>
    %26 = arith.addf %18, %25 : vector<8x256xf32>
    %c0_12 = arith.constant 0 : index
    %c0_13 = arith.constant 0 : index
    %27 = vector.load %arg3[%c0_12, %c0_13] : memref<8x1xf32, #tpu.memory_space<vmem>>, vector<8x1xf32>
    %28 = vector.broadcast %27 : vector<8x1xf32> to vector<8x256xf32>
    %29 = arith.addf %26, %28 : vector<8x256xf32>
    %c0_14 = arith.constant 0 : index
    %c0_15 = arith.constant 0 : index
    %c0_16 = arith.constant 0 : index
    %30 = vector.load %arg4[%c0_14, %c0_15, %c0_16] : memref<1x8x256xf32, #tpu.memory_space<vmem>>, vector<1x8x256xf32>
    %31 = vector.shape_cast %30 : vector<1x8x256xf32> to vector<8x256xf32>
    %32 = vector.shape_cast %29 : vector<8x256xf32> to vector<1x8x256xf32>
    tpu.vector_store %arg4[%c0_14, %c0_15, %c0_16], %32 {strides = array<i32>} : memref<1x8x256xf32, #tpu.memory_space<vmem>>, vector<1x8x256xf32>,
    return
  }
  func.func @transform_0(%arg0: i32) -> (i32, i32, i32) {
    %c0_i32 = arith.constant 0 : i32
    %c0_i32_0 = arith.constant 0 : i32
    %c0_i32_1 = arith.constant 0 : i32
    return %arg0, %c0_i32, %c0_i32_0 : i32, i32, i32
  }
  func.func @transform_1(%arg0: i32) -> (i32, i32, i32) {
    %c0_i32 = arith.constant 0 : i32
    %c0_i32_0 = arith.constant 0 : i32
    %c0_i32_1 = arith.constant 0 : i32
    %c0_i32_2 = arith.constant 0 : i32
    return %c0_i32, %c0_i32_0, %c0_i32_1 : i32, i32, i32
  }
  func.func @transform_2(%arg0: i32) -> (i32, i32) {
    %c0_i32 = arith.constant 0 : i32
    %c0_i32_0 = arith.constant 0 : i32
    %c0_i32_1 = arith.constant 0 : i32
    return %c0_i32, %c0_i32_0 : i32, i32
  }
  func.func @transform_3(%arg0: i32) -> (i32, i32, i32) {
    %c0_i32 = arith.constant 0 : i32
    %c0_i32_0 = arith.constant 0 : i32
    %c0_i32_1 = arith.constant 0 : i32
    return %arg0, %c0_i32, %c0_i32_0 : i32, i32, i32
  }
}

</mosaic_0001>

<bundles_post_ra>
// kernel: conv2d_pallas.1
= control target key start
LH: loop header
LB: loop body
LE: loop exit
PB: predicated region body
PF: predicated region fallthrough
CT: control target
= control target key end

     0   :  { %s549_s12 = smov 0   ;;  %s598_s0 = inlined_call_operand.vmem [shape: bf16[2,8,384], index: 0, kind: input, shape index: {}]   ;;  %s599_s1 = inlined_call_operand.vmem [shape: bf16[3,8,24], index: 1, kind: input, shape index: {}]   ;;  %s600_s2 = inlined_call_operand.vmem [shape: f32[8,1], index: 2, kind: input, shape index: {}]   ;;  %s601_s3 = inlined_call_operand.vmem [shape: f32[2,8,256], index: 3, kind: output, shape index: {}]  }
   0x1 LB: > { %s476_s13 = sadd.s32 4294967295, %s522_s12   ;;  %p480_p0 = scmp.ge.s32.totalorder %s522_s12, 1  ;;  %s522_s12 = sphi %s549_s12, %s13_s12  }
   0x2   : > { %p137_p1 = scmp.lt.s32.totalorder %s522_s12, 3 }
   0x4   : > { %p138_p2 = pnand %p480_p0, %p137_p1 }
   0x5   : > { %p161_p3 = scmp.lt.s32.totalorder (!%p138_p2), %s476_s13, 1  ;;  %s524_s18 = smov (!%p138_p2), 127   ;;  %vm188_vm0 = vcmask (!%p138_p2), 1039360   ;;  %vm200_vm1 = vcmask (!%p138_p2), 1043456   ;;  %vm197_vm2 = vcmask (!%p138_p2), 1031168   ;;  %v527_v18 = vmov (!%p138_p2), 0  }
   0x6   : > { %141 = sbr.rel (%p138_p2) target bundleno = 502 (0x1f6), region = 32  ;;  %s525_s19 = smov (!%p138_p2), 126   ;;  %279 = vmatprep.mubr.bf16.mxu0 (!%p138_p2), %v527_v18  ;;  %vm237_vm3 = vcmask (!%p138_p2), 195584   ;;  %v209_v19 = vld [vmem:[%s599_s1] sm:$0xf] (!%p138_p2)  ;;  %329 = vmatprep.mubr.bf16.mxu1 (!%p138_p2), %v527_v18  ;;  %vm230_vm4 = vcmask (!%p138_p2), 916480  }
   0x7   : > { %s526_s20 = smov (!%p138_p2), 112   ;;  %512 = vset.pattern.permute.xlu0 (!%p138_p2), %v527_v18  ;;  %s528_s23 = smov (!%p138_p2), 96   ;;  %v411_v20 = vld [vmem:[%s600_s2] sm:$0xff] (!%p138_p2)  ;;  %vm352_vm5 = vcmask (!%p138_p2), 785408   ;;  %v492_v44 = vld [vmem:[%s599_s1 + $0x8] sm:$0xf] (!%p138_p2) }
   0x8   : > { %v487_v35 = vld [vmem:[%s599_s1 + $0x4] sm:$0xf] (!%p138_p2) }
   0xd   : > { %s603_s13 = smov (!%p161_p3, %s476_s13), 1 }
   0xe   : > { %s498_s14 = smul.u32 12, %s603_s13  ;;  %s497_s30 = sshll.u32 %s603_s13, 4 }
   0xf   : > { %s170_s6 = scalar_lea.vmem %s601_s3, %s497_s30 }
  0x10   : > { %s165_s17 = scalar_lea.vmem %s598_s0, %s498_s14 }
  0x11   : > { %v172_v0 = vld [vmem:[%s165_s17] sm:$0xff]  ;;  %v515_v3 = vld [vmem:[%s165_s17 + $0x8] ss:$0 sps:$4 sm:$0xff]  }
  0x12   : > { %v485_v1 = vcombine.high %v172_v0, %v172_v0  ;;  %v484_v2 = vcombine.low %v172_v0, %v172_v0 }
  0x14   : > { %184 = vrot.lane.b32.xlu0 %v485_v1, %s524_s18  ;;  %182 = vrot.lane.b32.xlu1 %v484_v2, %s524_s18 }
  0x18   : > { %186 = vrot.lane.b32.xlu0 %v515_v3, %s524_s18  ;;  %191 = vrot.lane.b32.xlu1 %v484_v2, %s525_s19 }
  0x1c   : > { %193 = vrot.lane.b32.xlu0 %v485_v1, %s525_s19  ;;  %195 = vrot.lane.b32.xlu1 %v515_v3, %s525_s19 }
  0x86   : > { %v185_v4 = vpop.permute.xlu0 %184  ;;  %v183_v5 = vpop.permute.xlu1 %182 }
  0x87   : > { %v189_v6 = vsel %vm188_vm0, %v183_v5, %v185_v4 }
  0x88   : > { %v203_v11 = vsel %vm200_vm1, %v484_v2, %v189_v6 }
  0x8a   : > { %v187_v7 = vpop.permute.xlu0 %186  ;;  %v192_v8 = vpop.permute.xlu1 %191 }
  0x8b   : > { %v190_v9 = vsel %vm188_vm0, %v185_v4, %v187_v7  ;;  %v212_v17 = vsel %vm200_vm1, %v515_v3, %v187_v7 }
  0x8c   : > { %v207_v10 = vsel %vm200_vm1, %v485_v1, %v190_v9 }
  0x8d   : > { %297 = vmatprep.subr.bf16.mxu1 %v207_v10 }
  0x8e   : > { %v194_v12 = vpop.permute.xlu0 %193  ;;  %298 = vmatpush1.bf16.msra.mxu1 %v203_v11  ;;  %v196_v13 = vpop.permute.xlu1 %195 }
  0x8f   : > { %v198_v14 = vsel %vm197_vm2, %v192_v8, %v194_v12  ;;  %228 = vrot.lane.b32.xlu1 %v196_v13, %s526_s20  ;;  %v199_v15 = vsel %vm197_vm2, %v194_v12, %v196_v13 }
  0x90   : > { %226 = vrot.lane.b32.xlu0 %v199_v15, %s526_s20  ;;  %490 = vmatprep.subr.msk.bf16.mxu1 %vm200_vm1, %v199_v15  ;;  %v292_v16 = vsel %vm200_vm1, %v198_v14, 0 }
  0x92   : > { %300 = vmatpush1.bf16.msra.mxu1 %v292_v16 }
  0x93   : > { %222 = vrot.lane.b32.xlu1 %v212_v17, %s526_s20 }
  0x94   : > { %220 = vrot.lane.b32.xlu0 %v207_v10, %s526_s20 }
  0x95   : > { %491 = vmatmul.mubr.msk.bf16.vlgmr.msra.gmra.mrb[0].mxu1 %vm237_vm3, %v209_v19 }
  0x97   : > { %224 = vrot.lane.b32.xlu1 %v198_v14, %s526_s20 }
  0x98   : > { %218 = vrot.lane.b32.xlu0 %v203_v11, %s526_s20 }
  0x9b   : > { %344 = vrot.lane.b32.xlu1 %v212_v17, %s528_s23 }
  0x9c   : > { %342 = vrot.lane.b32.xlu0 %v207_v10, %s528_s23 }
  0x9f   : > { %346 = vrot.lane.b32.xlu1 %v198_v14, %s528_s23 }
  0xa0   : > { %340 = vrot.lane.b32.xlu0 %v203_v11, %s528_s23 }
  0xa3   : > { %350 = vrot.lane.b32.xlu1 %v196_v13, %s528_s23 }
  0xa4   : > { %348 = vrot.lane.b32.xlu0 %v199_v15, %s528_s23 }
  0xa8   : > { %414 = vperm.xlu0 %512, %v411_v20  }
 0x101   : > { %v229_v21 = vpop.permute.xlu1 %228 }
 0x102   : > { %v227_v22 = vpop.permute.xlu0 %226 }
 0x103   : > { %v234_v29 = vsel %vm230_vm4, %v227_v22, %v229_v21 }
 0x105   : > { %v223_v23 = vpop.permute.xlu1 %222 }
 0x106   : > { %v221_v24 = vpop.permute.xlu0 %220 }
 0x107   : > { %v232_v25 = vsel %vm230_vm4, %v221_v24, %v223_v23 }
 0x108   : > { %247 = vmatprep.subr.bf16.mxu0 %v232_v25 }
 0x109   : > { %v225_v26 = vpop.permute.xlu1 %224 }
 0x10a   : > { %v219_v27 = vpop.permute.xlu0 %218  ;;  %v233_v30 = vsel %vm230_vm4, %v225_v26, %v227_v22 }
 0x10b   : > { %v231_v28 = vsel %vm230_vm4, %v219_v27, %v221_v24  ;;  %v242_v33 = vsel %vm200_vm1, %v233_v30, 0 }
 0x10c   : > { %248 = vmatpush1.bf16.msra.mxu0 %v231_v28 }
 0x10d   : > { %488 = vmatprep.subr.msk.bf16.mxu0 %vm200_vm1, %v234_v29  ;;  %v345_v31 = vpop.permute.xlu1 %344 }
 0x10e   : > { %v343_v32 = vpop.permute.xlu0 %342 }
 0x10f   : > { %v354_v34 = vsel %vm352_vm5, %v343_v32, %v345_v31 }
 0x110   : > { %250 = vmatpush1.bf16.msra.mxu0 %v242_v33 }
 0x111   : > { %368 = vmatprep.subr.bf16.mxu0 %v354_v34  ;;  %v347_v36 = vpop.permute.xlu1 %346 }
 0x112   : > { %v341_v37 = vpop.permute.xlu0 %340 }
 0x113   : > { %v353_v38 = vsel %vm352_vm5, %v341_v37, %v343_v32  ;;  %489 = vmatmul.mubr.msk.bf16.vlgmr.msra.gmra.mrb[0].mxu0 %vm237_vm3, %v487_v35 }
 0x114   : > { %369 = vmatpush1.bf16.msra.mxu0 %v353_v38  ;;  %400 = vmatprep.mubr.bf16.mxu0 %v527_v18 }
 0x115   : > { %v351_v39 = vpop.permute.xlu1 %350 }
 0x116   : > { %v349_v40 = vpop.permute.xlu0 %348 }
 0x117   : > { %v355_v41 = vsel %vm352_vm5, %v347_v36, %v349_v40  ;;  %v356_v42 = vsel %vm352_vm5, %v349_v40, %v351_v39 }
 0x118   : > { %v363_v43 = vsel %vm200_vm1, %v355_v41, 0  ;;  %493 = vmatprep.subr.msk.bf16.mxu0 %vm200_vm1, %v356_v42 }
 0x119   : > { %371 = vmatpush1.bf16.msra.mxu0 %v363_v43 }
 0x11c   : > { %494 = vmatmul.mubr.msk.bf16.vlgmr.msra.gmra.mrb[4].mxu0 %vm237_vm3, %v492_v44 }
 0x127   : > { %v415_v56 = vpop.permute.xlu0 %414 }
 0x168   : > { %v331_v45 = vpop.f32.mrb[0].mxu1 }
 0x169   : > { %v333_v46 = vpop.f32.mrb[1].mxu1 }
 0x16a   : > { %v335_v47 = vpop.f32.mrb[2].mxu1 }
 0x16b   : > { %v336_v48 = vpop.f32.mrb[3].mxu1 }
 0x1e6   : > { %v281_v49 = vpop.f32.mrb[0].mxu0 }
 0x1e7   : > { %v283_v50 = vpop.f32.mrb[1].mxu0  ;;  %v332_v51 = vadd.f32 %v331_v45, %v281_v49 }
 0x1e8   : > { %v285_v52 = vpop.f32.mrb[2].mxu0  ;;  %v334_v53 = vadd.f32 %v333_v46, %v283_v50 }
 0x1e9   : > { %v286_v54 = vpop.f32.mrb[3].mxu0 }
 0x1ef   : > { %v402_v55 = vpop.f32.mrb[4].mxu0 }
 0x1f0   : > { %v409_v57 = vadd.f32 %v402_v55, %v332_v51  ;;  %v404_v58 = vpop.f32.mrb[5].mxu0 }
 0x1f1   : > { %v410_v59 = vadd.f32 %v404_v58, %v334_v53  ;;  %v406_v60 = vpop.f32.mrb[6].mxu0 }
 0x1f2   : > { %v417_v61 = vadd.f32 %v415_v56, %v409_v57  ;;  %v407_v62 = vpop.f32.mrb[7].mxu0 }
 0x1f3   : > { %v418_v63 = vadd.f32 %v415_v56, %v410_v59 }
 0x1f4   : > { %419 = vst [vmem:[%s170_s6] sm:$0xff] %v417_v61 }
 0x1f5   : > { %420 = vst [vmem:[%s170_s6 + $0x8] sm:$0xff] %v418_v63 }
 0x1f6 PF: > { %s13_s12 = sadd.s32 1, %s522_s12  }
 0x1f7   : > { %p10_p4 = scmp.ge.s32.totalorder %s13_s12, 4  }
 0x1f9   :  { %12 = sbr.rel (!%p10_p4) target bundleno = 1 (0x1), region = 64 }

</bundles_post_ra>
